<compile_context>
chip_gen: v7x
topology: tpu7x:2x2x1
jax: 0.10.0
libtpu: 0.0.40
codegen_flags: <defaults>
</compile_context>

<pallas_src>
import jax
import jax.numpy as jnp
from jax import lax
from jax.experimental import pallas as pl
from jax.experimental.pallas import tpu as pltpu

HIDDEN = 20
_LANE = 128
_SINGLE_TILE_MAX = 1024                 # one grid step below this batch size
_X_BUF_BYTES = 12 * 1024 * 1024         # per-buffer VMEM budget for the padded x tile
_VMEM_LIMIT = 48 * 1024 * 1024          # < v7x's 64 MiB/TC physical VMEM


def _round_up(x, m):
    return (x + m - 1) // m * m


def _cdiv(a, b):
    return -(-a // b)


def _pick_tile_b(batch, dims, itemsize):
    """Batch-tile rows, sized by (lane-padded) VMEM bytes, not by a row cap."""
    if batch <= _SINGLE_TILE_MAX:
        return batch                     # full-extent block: always layout-legal
    padded_row = _round_up(dims, _LANE) * itemsize     # VMEM bytes of one x row
    tile = _X_BUF_BYTES // max(padded_row, 1)
    # Keep >= 2 grid steps so the batch axis can shard across v7x's 2 TensorCores.
    tile = min(tile, _round_up(_cdiv(batch, 2), _LANE))
    # Multiple of 128 rows: rows land on output LANES (dense vst) and this also
    # covers f32 (8) / bf16 (16) sublane packing of the x tile.
    tile = max(_LANE, (tile // _LANE) * _LANE)
    if tile >= batch:
        return batch
    return tile


def _mlp_kernel(x_ref, w1t_ref, b1_ref, w2_ref, b2_ref, o_ref):
    # ---- Layer 1 on the MXU with batch on LANES:
    #   (H, dims) . (tile_b, dims)^T -> (H, tile_b)
    # q@kT-style contraction (both last dims) -> no explicit transpose of the
    # big x tile; f32 accumulation.
    z1 = lax.dot_general(
        w1t_ref[...], x_ref[...],
        dimension_numbers=(((1,), (1,)), ((), ())),
        preferred_element_type=jnp.float32)
    a1 = jax.nn.sigmoid(z1 + b1_ref[...])          # b1: (H, 1) broadcast over lanes

    # ---- Layer 2 (20 -> 1) off the MXU: VPU multiply + sublane (XLU) reduce;
    # output stays lane-dense.  b2 is a scalar read from SMEM.
    z2 = jnp.sum(a1 * w2_ref[...], axis=0, keepdims=True) + b2_ref[0, 0]
    o_ref[...] = jax.nn.sigmoid(z2).astype(o_ref.dtype)       # (1, tile_b)


def feed_forward_nn(x, w1, b1, w2, b2, *, tile_b=None):
    """x: [B, dims] (f32 or bf16); w1: [dims, 20]; b1: [1, 20]; w2: [20, 1];
    b2: [1, 1].  Returns [B, 1] f32 (same math as the PyTorch forward)."""
    B, dims = x.shape
    H = w1.shape[1]
    assert w1.shape == (dims, H) and b1.shape == (1, H)
    assert w2.shape == (H, 1) and b2.shape == (1, 1)

    itemsize = jnp.dtype(x.dtype).itemsize
    if tile_b is None:
        tile_b = _pick_tile_b(B, dims, itemsize)
    else:
        tile_b = B if tile_b >= B else max(_LANE, _round_up(tile_b, _LANE))
    num_tiles = _cdiv(B, tile_b)
    total = num_tiles * tile_b

    # Small params massaged once in the wrapper (negligible bytes).  x itself is
    # NOT copied, padded or cast -- it streams straight from HBM in its dtype.
    w1t = w1.astype(x.dtype).T                        # (H, dims)
    b1c = b1.astype(jnp.float32).reshape(H, 1)        # (H, 1) column
    w2c = w2.astype(jnp.float32).reshape(H, 1)        # (H, 1) column
    b2s = b2.astype(jnp.float32).reshape(1, 1)        # scalar via SMEM

    cost = pl.CostEstimate(
        flops=int(2 * B * H * (dims + 1)),
        transcendentals=int(B * (H + 1)),
        bytes_accessed=int(B * dims * itemsize        # x stream (no pad copy)
                           + dims * H * itemsize      # w1
                           + (3 * H + 1) * 4          # b1, w2, b2
                           + total * 4),              # output row
    )

    out = pl.pallas_call(
        _mlp_kernel,
        out_shape=jax.ShapeDtypeStruct((1, total), jnp.float32),
        grid=(num_tiles,),
        in_specs=[
            # x: streamed per batch tile (double-buffered by the pipeline);
            # ragged last block handled by Pallas, garbage rows discarded below.
            pl.BlockSpec((tile_b, dims), lambda i: (i, 0)),
            # Weights / biases: same block every step -> resident in VMEM.
            pl.BlockSpec((H, dims), lambda i: (0, 0)),
            pl.BlockSpec((H, 1), lambda i: (0, 0)),
            pl.BlockSpec((H, 1), lambda i: (0, 0)),
            # b2: single scalar -> SMEM (no VMEM DMA / vreg broadcast).
            pl.BlockSpec(memory_space=pltpu.MemorySpace.SMEM),
        ],
        # Lane-dense output: one (1, tile_b) row per grid step.
        out_specs=pl.BlockSpec((1, tile_b), lambda i: (0, i)),
        compiler_params=pltpu.CompilerParams(
            dimension_semantics=("parallel",),        # megacore sharding on v7x
            vmem_limit_bytes=_VMEM_LIMIT,
        ),
        cost_estimate=cost,
    )(x, w1t, b1c, w2c, b2s)

    return out[0, :B].reshape(B, 1)


def init_params(key, dims, hidden=HIDDEN):
    """Deterministic init mimicking PyTorch nn.Linear (uniform +-1/sqrt(fan_in))."""
    k1, k2, k3, k4 = jax.random.split(key, 4)
    bound1 = 1.0 / jnp.sqrt(dims)
    bound2 = 1.0 / jnp.sqrt(hidden)
    w1 = jax.random.uniform(k1, (dims, hidden), jnp.float32, -bound1, bound1)
    b1 = jax.random.uniform(k2, (1, hidden), jnp.float32, -bound1, bound1)
    w2 = jax.random.uniform(k3, (hidden, 1), jnp.float32, -bound2, bound2)
    b2 = jax.random.uniform(k4, (1, 1), jnp.float32, -bound2, bound2)
    return w1, b1, w2, b2


def reference_forward(x, w1, b1, w2, b2):
    a1 = jax.nn.sigmoid(x.astype(jnp.float32) @ w1 + b1)
    return jax.nn.sigmoid(a1 @ w2 + b2)


if __name__ == "__main__":
    key = jax.random.PRNGKey(0)
    kx, kp, kx2 = jax.random.split(key, 3)

    dims = 32
    w1, b1, w2, b2 = init_params(kp, dims)

    # 1) Small single-tile case (toy module sizes).
    B = 8
    x = jax.random.normal(kx, (B, dims), jnp.float32)
    out = jax.block_until_ready(feed_forward_nn(x, w1, b1, w2, b2))
    ref = reference_forward(x, w1, b1, w2, b2)
    assert out.shape == (B, 1)
    assert jnp.allclose(out, ref, atol=1e-3), float(jnp.max(jnp.abs(out - ref)))

    # 2) Multi-tile case: exercises the batch grid, resident weights, the
    #    ragged (un-padded) edge block and the lane-dense output row.
    #    B=300 with tile_b=128 -> grid of 3; rows past 300 are discarded.
    B2 = 300
    x2 = jax.random.normal(kx2, (B2, dims), jnp.float32)
    out2 = jax.block_until_ready(feed_forward_nn(x2, w1, b1, w2, b2, tile_b=128))
    ref2 = reference_forward(x2, w1, b1, w2, b2)
    assert out2.shape == (B2, 1)
    assert jnp.allclose(out2, ref2, atol=1e-3), float(jnp.max(jnp.abs(out2 - ref2)))

    # 3) bf16 x streamed directly (no wrapper round-trip cast of x; weights are
    #    cast in-wrapper, accumulation and sigmoids stay f32 in-kernel).
    out3 = jax.block_until_ready(
        feed_forward_nn(x.astype(jnp.bfloat16), w1, b1, w2, b2))
    assert jnp.allclose(out3, ref, atol=5e-2)

    print("KERNEL_OK")
</pallas_src>

<mosaic_0001>
module attributes {stable_mosaic.version = 11 : i64} {
  func.func @_mlp_kernel(%arg0: i32, %arg1: memref<8x32xf32, #tpu.memory_space<vmem>>, %arg2: memref<20x32xf32, #tpu.memory_space<vmem>>, %arg3: memref<20x1xf32, #tpu.memory_space<vmem>>, %arg4: memref<20x1xf32, #tpu.memory_space<vmem>>, %arg5: memref<1x1xf32, #tpu.memory_space<smem>>, %arg6: memref<1x8xf32, #tpu.memory_space<vmem>>) attributes {dimension_semantics = [#tpu.dimension_semantics<parallel>], iteration_bounds = array<i64: 1>, scalar_prefetch = 0 : i64, scratch_operands = 0 : i64, tpu.core_type = #tpu.core_type<tc>, window_params = [{transform_indices = @transform_0, window_bounds = array<i64: 8, 32>}, {pipeline_mode = #tpu.pipeline_mode<synchronous>, transform_indices = @transform_1, window_bounds = array<i64: 20, 32>}, {pipeline_mode = #tpu.pipeline_mode<synchronous>, transform_indices = @transform_2, window_bounds = array<i64: 20, 1>}, {pipeline_mode = #tpu.pipeline_mode<synchronous>, transform_indices = @transform_3, window_bounds = array<i64: 20, 1>}, {transform_indices = @transform_4, window_bounds = array<i64: 1, 1>}, {transform_indices = @transform_5, window_bounds = array<i64: 1, 8>}]} {
    %c0 = arith.constant 0 : index
    %c0_0 = arith.constant 0 : index
    %0 = vector.load %arg2[%c0, %c0_0] : memref<20x32xf32, #tpu.memory_space<vmem>>, vector<20x32xf32>
    %c0_1 = arith.constant 0 : index
    %c0_2 = arith.constant 0 : index
    %1 = vector.load %arg1[%c0_1, %c0_2] : memref<8x32xf32, #tpu.memory_space<vmem>>, vector<8x32xf32>
    %cst = arith.constant dense<0.000000e+00> : vector<20x8xf32>
    %2 = tpu.matmul %0, %1, %cst {dimension_numbers = #tpu.dot_dimension_numbers<[1], [1], [0], [0], [0, 0, 1, 0], [], []>} : vector<20x32xf32>, vector<8x32xf32>, vector<20x8xf32> -> vector<20x8xf32>
    %c0_3 = arith.constant 0 : index
    %c0_4 = arith.constant 0 : index
    %3 = vector.load %arg3[%c0_3, %c0_4] : memref<20x1xf32, #tpu.memory_space<vmem>>, vector<20x1xf32>
    %4 = vector.broadcast %3 : vector<20x1xf32> to vector<20x8xf32>
    %5 = arith.addf %2, %4 : vector<20x8xf32>
    %6 = arith.negf %5 : vector<20x8xf32>
    %7 = math.exp %6 : vector<20x8xf32>
    %cst_5 = arith.constant 1.000000e+00 : f32
    %8 = vector.broadcast %cst_5 : f32 to vector<20x8xf32>
    %9 = arith.addf %8, %7 : vector<20x8xf32>
    %10 = arith.divf %8, %9 : vector<20x8xf32>
    %c0_6 = arith.constant 0 : index
    %c0_7 = arith.constant 0 : index
    %11 = vector.load %arg4[%c0_6, %c0_7] : memref<20x1xf32, #tpu.memory_space<vmem>>, vector<20x1xf32>
    %12 = vector.broadcast %11 : vector<20x1xf32> to vector<20x8xf32>
    %13 = arith.mulf %10, %12 : vector<20x8xf32>
    %cst_8 = arith.constant dense<0.000000e+00> : vector<8xf32>
    %14 = vector.multi_reduction <add>, %13, %cst_8 [0] : vector<20x8xf32> to vector<8xf32>
    %15 = vector.shape_cast %14 : vector<8xf32> to vector<1x8xf32>
    %c0_9 = arith.constant 0 : index
    %c0_10 = arith.constant 0 : index
    %16 = memref.load %arg5[%c0_9, %c0_10] : memref<1x1xf32, #tpu.memory_space<smem>>
    %17 = vector.broadcast %16 : f32 to vector<1x8xf32>
    %18 = arith.addf %15, %17 : vector<1x8xf32>
    %19 = arith.negf %18 : vector<1x8xf32>
    %20 = math.exp %19 : vector<1x8xf32>
    %cst_11 = arith.constant 1.000000e+00 : f32
    %21 = vector.broadcast %cst_11 : f32 to vector<1x8xf32>
    %22 = arith.addf %21, %20 : vector<1x8xf32>
    %23 = arith.divf %21, %22 : vector<1x8xf32>
    %c0_12 = arith.constant 0 : index
    %c0_13 = arith.constant 0 : index
    %24 = vector.load %arg6[%c0_12, %c0_13] : memref<1x8xf32, #tpu.memory_space<vmem>>, vector<1x8xf32>
    tpu.vector_store %arg6[%c0_12, %c0_13], %23 {strides = array<i32>} : memref<1x8xf32, #tpu.memory_space<vmem>>, vector<1x8xf32>,
    return
  }
  func.func @transform_0(%arg0: i32) -> (i32, i32) {
    %c0_i32 = arith.constant 0 : i32
    %c0_i32_0 = arith.constant 0 : i32
    return %arg0, %c0_i32 : i32, i32
  }
  func.func @transform_1(%arg0: i32) -> (i32, i32) {
    %c0_i32 = arith.constant 0 : i32
    %c0_i32_0 = arith.constant 0 : i32
    %c0_i32_1 = arith.constant 0 : i32
    return %c0_i32, %c0_i32_0 : i32, i32
  }
  func.func @transform_2(%arg0: i32) -> (i32, i32) {
    %c0_i32 = arith.constant 0 : i32
    %c0_i32_0 = arith.constant 0 : i32
    %c0_i32_1 = arith.constant 0 : i32
    return %c0_i32, %c0_i32_0 : i32, i32
  }
  func.func @transform_3(%arg0: i32) -> (i32, i32) {
    %c0_i32 = arith.constant 0 : i32
    %c0_i32_0 = arith.constant 0 : i32
    %c0_i32_1 = arith.constant 0 : i32
    return %c0_i32, %c0_i32_0 : i32, i32
  }
  func.func @transform_4(%arg0: i32) -> (i32, i32) {
    %c0_i32 = arith.constant 0 : i32
    %c0_i32_0 = arith.constant 0 : i32
    %c0_i32_1 = arith.constant 0 : i32
    return %c0_i32, %c0_i32_0 : i32, i32
  }
  func.func @transform_5(%arg0: i32) -> (i32, i32) {
    %c0_i32 = arith.constant 0 : i32
    %c0_i32_0 = arith.constant 0 : i32
    return %c0_i32, %arg0 : i32, i32
  }
}

</mosaic_0001>

<bundles_post_ra>
// kernel: tpu_custom_call.1
= control target key start
LH: loop header
LB: loop body
LE: loop exit
PB: predicated region body
PF: predicated region fallthrough
CT: control target
= control target key end

     0   :  { %vm44_vm0 = vcmask 261120   ;;  %v285_v1 = vmov 0.0   ;;  %vm286_vm1 = vmmov 0   ;;  %s369_s0 = inlined_call_operand.vmem [shape: f32[8,32], index: 0, kind: input, shape index: {}]   ;;  %s370_s1 = inlined_call_operand.vmem [shape: f32[20,32], index: 1, kind: input, shape index: {}]   ;;  %s371_s2 = inlined_call_operand.vmem [shape: f32[20,1], index: 2, kind: input, shape index: {}]   ;;  %s372_s3 = inlined_call_operand.vmem [shape: f32[20,1], index: 3, kind: input, shape index: {}]   ;;  %s373_s4 = inlined_call_operand.<no memory space> [shape: f32[1,1], index: 4, kind: input, shape index: {}]   ;;  %s374_s5 = inlined_call_operand.hbm [shape: f32[1,8], index: 5, kind: output, shape index: {}]  }
   0x1   :  { %v25_v0 = vld [vmem:[%s369_s0] sm:$0xff]  ;;  %226 = vmatprep.subr.mxu0 %v285_v1  ;;  %237 = vmatprep.subr.mxu1 %v285_v1  ;;  %v23_v3 = vld [vmem:[%s370_s1 + $0x8] sm:$0xff] }
   0x2   :  { %227 = vmatpush3.xpose.msk.msra.mxu0 %vm44_vm0, %v25_v0  ;;  %238 = vmatpush3.xpose.msk.msra.mxu1 %vm44_vm0, %v25_v0  ;;  %v22_v2 = vld [vmem:[%s370_s1] sm:$0xff] }
   0x3   :  { %228 = vmatprep.mubr.msk.f32.mxu0 %vm286_vm1, %v285_v1  ;;  %231 = vmatprep.mubr.msk.f32.mxu1 %vm286_vm1, %v285_v1  ;;  %v26_v4 = vld [vmem:[%s371_s2] sm:$0xff] }
   0x4   :  { %11 = vsyncpa [#allocation4], 0  ;;  %v287_v5 = vmov 0   ;;  %v28_v6 = vld [vmem:[%s371_s2 + $0x10] sm:$0xf]  ;;  %v27_v8 = vld [vmem:[%s371_s2 + $0x8] sm:$0xff]  ;;  %v190_v52 = vstv %s373_s4 }
   0x5   :  { %243 = vset.pattern.permute.xlu0 %v287_v5  ;;  %244 = vset.pattern.permute.xlu1 %v287_v5  ;;  %v24_v7 = vld [vmem:[%s370_s1 + $0x10] sm:$0xf]  ;;  %v155_v9 = vld [vmem:[%s372_s3] sm:$0xff]  ;;  %v156_v10 = vld [vmem:[%s372_s3 + $0x8] sm:$0xff]  ;;  %vm176_vm2 = vcmask 64512   ;;  %vm180_vm3 = vcmask 60416  }
   0x6   :  { %229 = vmatmul.mubr.msk.f32.vlgmr.msra.gmra.mrb[0].mxu0 %vm44_vm0, %v22_v2  ;;  %232 = vmatmul.mubr.msk.f32.vlgmr.msra.gmra.mrb[0].mxu1 %vm44_vm0, %v23_v3  ;;  %v157_v11 = vld [vmem:[%s372_s3 + $0x10] sm:$0xf]  ;;  %s288_s11 = smov [#allocation3]   ;;  %vm198_vm4 = vcmask 57344  }
   0x7   :  { %234 = vmatprep.mubr.msk.f32.mxu1 %vm286_vm1, %v285_v1  ;;  %31 = vperm.xlu0 %243, %v26_v4   ;;  %s206_s12 = sshll.u32 %s288_s11, 4  ;;  %s207_s12 = int_to_ptr.vmem [resolvable:$true] %s206_s12 }
   0x8   :  { %41 = vperm.xlu1 %244, %v28_v6   ;;  %s261_s13 = scalar_lea.vmem %s207_s12, 16  ;;  %s265_s14 = scalar_lea.vmem %s207_s12, 32 }
   0x9   :  { %p262_p0 = scmp.ne.s32.totalorder %s207_s12, %s261_s13  ;;  %p266_p1 = scmp.lt.s32.totalorder %s207_s12, %s207_s12 }
   0xa   :  { %235 = vmatmul.mubr.msk.f32.gmra.mrb[2].mxu1 %vm44_vm0, %v24_v7  ;;  %p267_p2 = scmp.lt.s32.totalorder %s265_s14, %s261_s13 }
   0xb   :  { %36 = vperm.xlu0 %243, %v27_v8  }
   0xc   :  { %160 = vperm.xlu1 %244, %v155_v9   ;;  %p268_p3 = por %p267_p2, %p266_p1 }
   0xe   :  { %p269_p4 = pnand %p268_p3, %p262_p0 }
   0xf   :  { %165 = vperm.xlu0 %243, %v156_v10  }
  0x10   :  { %170 = vperm.xlu1 %244, %v157_v11  }
  0x86   :  { %v32_v12 = vpop.permute.xlu0 %31 }
  0x87   :  { %v42_v22 = vpop.permute.xlu1 %41 }
  0x8a   :  { %v37_v13 = vpop.permute.xlu0 %36 }
  0x8b   :  { %v161_v33 = vpop.permute.xlu1 %160 }
  0x8e   :  { %v166_v36 = vpop.permute.xlu0 %165 }
  0x8f   :  { %v171_v42 = vpop.permute.xlu1 %170 }
  0xd9   :  { %v123_v14 = vpop.f32.mrb[0].mxu0  ;;  %v128_v15 = vpop.f32.mrb[0].mxu1 }
  0xda   :  { %v124_v16 = vadd.f32 %v123_v14, %v32_v12  ;;  %v129_v17 = vadd.f32 %v128_v15, %v37_v13  ;;  %v233_v18 = vpop.f32.mrb[1].mxu1  ;;  %v230_v19 = vpop.f32.mrb[1].mxu0 }
  0xdc   :  { %v218_v20 = vmul.f32 -1.442695, %v124_v16  ;;  %v219_v21 = vmul.f32 -1.442695, %v129_v17 }
  0xdd   :  { %v133_v23 = vpop.f32.mrb[2].mxu1 }
  0xde   :  { %245 = vpow2.f32 %v218_v20  ;;  %v134_v24 = vadd.f32 %v133_v23, %v42_v22  ;;  %v236_v25 = vpop.f32.mrb[3].mxu1 }
  0xdf   :  { %247 = vpow2.f32 %v219_v21 }
  0xe0   :  { %v220_v26 = vmul.f32 -1.442695, %v134_v24 }
  0xe2   :  { %249 = vpow2.f32 %v220_v26 }
  0xe8   :  { %v246_v27 = vpop.eup %245 }
  0xe9   :  { %v248_v28 = vpop.eup %247  ;;  %v146_v29 = vadd.f32 1.0, %v246_v27 }
  0xea   :  { %v147_v30 = vadd.f32 1.0, %v248_v28 }
  0xeb   :  { %251 = vrcp.f32 %v146_v29 }
  0xec   :  { %v250_v31 = vpop.eup %249  ;;  %253 = vrcp.f32 %v147_v30 }
  0xed   :  { %v148_v32 = vadd.f32 1.0, %v250_v31 }
  0xef   :  { %255 = vrcp.f32 %v148_v32 }
  0xf5   :  { %v252_v34 = vpop.eup %251 }
  0xf6   :  { %v254_v35 = vpop.eup %253  ;;  %v173_v37 = vmul.f32 %v252_v34, %v161_v33 }
  0xf7   :  { %v174_v38 = vmul.f32 %v254_v35, %v166_v36 }
  0xf8   :  { %v177_v39 = vsel %vm176_vm2, %v173_v37, 0.0 }
  0xf9   :  { %v256_v40 = vpop.eup %255  ;;  %v178_v41 = vsel %vm176_vm2, %v174_v38, 0.0 }
  0xfa   :  { %v179_v43 = vadd.f32 %v178_v41, %v177_v39  ;;  %v175_v44 = vmul.f32 %v256_v40, %v171_v42 }
  0xfc   :  { %v181_v45 = vsel %vm180_vm3, %v175_v44, 0.0 }
  0xfd   :  { %v182_v46 = vadd.f32 %v181_v45, %v179_v43 }
  0xff   :  { %v183_v47 = vrot.slane %v182_v46, 4 }
 0x101   :  { %v184_v48 = vadd.f32 %v183_v47, %v182_v46 }
 0x103   :  { %v185_v49 = vrot.slane %v184_v48, 2 }
 0x105   :  { %v186_v50 = vadd.f32 %v185_v49, %v184_v48 }
 0x107   :  { %v187_v51 = vrot.slane %v186_v50, 1 }
 0x109   :  { %v188_v53 = vadd.f32 %v187_v51, %v186_v50 }
 0x10b   :  { %v191_v54 = vadd.f32 %v190_v52, %v188_v53 }
 0x10d   :  { %v221_v55 = vmul.f32 -1.442695, %v191_v54 }
 0x10f   :  { %257 = vpow2.f32 %v221_v55 }
 0x119   :  { %v258_v56 = vpop.eup %257 }
 0x11a   :  { %v195_v57 = vadd.f32 1.0, %v258_v56 }
 0x11c   :  { %259 = vrcp.f32 %v195_v57 }
 0x126   :  { %v260_v58 = vpop.eup %259 }
 0x127   :  { %199 = vst.msk [vmem:[#allocation3] sm:$0x1] %vm198_vm4, %v260_v58 }
 0x128   :  { %272 = shalt.err (!%p269_p4)
}
 0x129   :  { %s273_s16 = scalar_lea.hbm %s374_s5, 16 }
 0x12a   :  { %p274_p5 = scmp.ne.s32.totalorder %s374_s5, %s273_s16  ;;  %p277_p6 = scmp.lt.u32.totalorder %s273_s16, %s374_s5 }
 0x12c   :  { %p279_p7 = pnand %p277_p6, %p274_p5 }
 0x12e   :  { %282 = shalt.err (!%p279_p7)
}
 0x12f   :  { %209 = dma.vmem_to_hbm [thread:$0]  %s207_s12, 16, %s374_s5, [#allocation4]  }
 0x130   :  { %283 = dma.done.wait [#allocation4], 16  }
 0x131   :  { %284 = vsyncadd [#allocation4], 4294967280 }
 0x132   :  { %213 = vsyncpa [#allocation4], 1 }

</bundles_post_ra>
